<compile_context>
chip_gen: v5e
topology: v5e:2x2
jax: 0.10.0
libtpu: 0.0.40
codegen_flags: <defaults>
</compile_context>

<pallas_src>
import functools
import math

import jax
import jax.numpy as jnp
from jax.experimental import pallas as pl
from jax.experimental.pallas import tpu as pltpu


_LANE = 128


def _round_up(v, m):
    return ((v + m - 1) // m) * m


def _pad2(a, rows, cols):
    r, c = a.shape
    return jnp.pad(a, ((0, rows - r), (0, cols - c)))


# ---------------------------------------------------------------------------
# Generation-aware VMEM budgeting
# ---------------------------------------------------------------------------
def _vmem_capacity_bytes():
    """Physical VMEM of the current chip; conservative 64 MiB fallback (v7x)."""
    try:
        cap = int(pltpu.get_tpu_info().vmem_capacity_bytes)
        if cap >= 32 * 2**20:
            return cap
    except Exception:
        pass
    return 64 * 2**20


def _fuse_budget(cap):
    # ~100 MiB on 128-MiB chips (v5e/v6e), ~40 MiB on v7x's 64 MiB.
    return min(100 * 2**20, cap - 24 * 2**20)


def _vmem_limit(est_bytes, cap):
    # Scoped-VMEM limit: est already counts 2x buffers; leave compiler headroom.
    return int(max(32 * 2**20,
                   min(cap - 16 * 2**20, int(est_bytes) + 16 * 2**20)))


def _derive_tm(np_, hp, budget):
    """Largest row-stripe (multiple of 16) whose double-buffered working set
    (adj stripe + resident h + x0a/out stripes + W1) fits the budget."""
    denom = 4 * np_ + 8 * hp                       # bytes per row of tm
    avail = budget - 4 * hp * (np_ + hp) - (2 << 20)
    tm = avail // denom if avail > 0 else 16
    tm = min(int(tm), np_, 2048)
    return int(max(16, (tm // 16) * 16))


# ---------------------------------------------------------------------------
# Kernels
# ---------------------------------------------------------------------------
def _gcn2_fused_kernel(h0_ref, x0a_ref, adj_ref, w1_ref, o_ref, h_vmem):
    """Whole GCN2Conv stack.  Grid axis = layers; adj / h0 / alpha*x0 stay
    resident in VMEM, h is carried in a bf16 scratch, output written once."""
    l = pl.program_id(0)

    @pl.when(l == 0)
    def _init():
        h_vmem[...] = h0_ref[...]                       # h starts at x0 (bf16)

    # t = adj_eff @ h + alpha*x0          (bf16 MXU inputs, f32 accumulation)
    agg = jnp.dot(adj_ref[...], h_vmem[...],
                  preferred_element_type=jnp.float32)
    t = agg + x0a_ref[...].astype(jnp.float32)          # f32 elementwise
    # h = relu(t @ W1_eff[l]);  W1_eff is f32 so the (1-beta)*I part is exact.
    h = jnp.dot(t, w1_ref[0], preferred_element_type=jnp.float32)
    h = jnp.maximum(h, 0.0).astype(jnp.bfloat16)
    h_vmem[...] = h

    @pl.when(l == pl.num_programs(0) - 1)
    def _final():
        o_ref[...] = h                                  # single bf16 writeback


def _gcn2_tiled_layer_kernel(adj_ref, h_ref, x0a_ref, w1_ref, o_ref, *, omb):
    """One GCN2Conv layer, one (TM, Hpad) row stripe per grid step.
    omb = 1 - beta_l is a compile-time constant; w1_ref holds beta_l*W1_l."""
    agg = jnp.dot(adj_ref[...], h_ref[...],             # bf16 x bf16 -> f32
                  preferred_element_type=jnp.float32)
    t = agg + x0a_ref[...].astype(jnp.float32)          # f32 elementwise
    h = omb * t + jnp.dot(t.astype(jnp.bfloat16), w1_ref[...],
                          preferred_element_type=jnp.float32)
    o_ref[...] = jnp.maximum(h, 0.0).astype(jnp.bfloat16)   # bf16 output stream


# ---------------------------------------------------------------------------
# Pallas wrappers
# ---------------------------------------------------------------------------
def _gcn2_forward_fused(adj_eff, h0b, x0a_b, w1eff, *, vmem_limit):
    np_, hp = h0b.shape
    num_layers = w1eff.shape[0]
    return pl.pallas_call(
        _gcn2_fused_kernel,
        out_shape=jax.ShapeDtypeStruct((np_, hp), jnp.bfloat16),
        grid=(num_layers,),
        in_specs=[
            pl.BlockSpec((np_, hp), lambda l: (0, 0)),       # h0 (resident)
            pl.BlockSpec((np_, hp), lambda l: (0, 0)),       # alpha*x0 (resident)
            pl.BlockSpec((np_, np_), lambda l: (0, 0)),      # adj_eff (resident)
            pl.BlockSpec((1, hp, hp), lambda l: (l, 0, 0)),  # W1_eff[l] (f32)
        ],
        out_specs=pl.BlockSpec((np_, hp), lambda l: (0, 0)),
        scratch_shapes=[pltpu.VMEM((np_, hp), jnp.bfloat16)],  # h carry (bf16)
        compiler_params=pltpu.CompilerParams(
            dimension_semantics=("arbitrary",),              # sequential carry
            vmem_limit_bytes=vmem_limit),
    )(h0b, x0a_b, adj_eff, w1eff)


def _pallas_gcn2_layer_tiled(adj_eff, h, x0a, w1b, *, omb, tm, vmem_limit):
    np_, hp = h.shape
    return pl.pallas_call(
        functools.partial(_gcn2_tiled_layer_kernel, omb=float(omb)),
        out_shape=jax.ShapeDtypeStruct((np_, hp), jnp.bfloat16),
        grid=(pl.cdiv(np_, tm),),
        in_specs=[
            pl.BlockSpec((tm, np_), lambda i: (i, 0)),   # adj stripe (bf16)
            pl.BlockSpec((np_, hp), lambda i: (0, 0)),   # h (resident, bf16)
            pl.BlockSpec((tm, hp), lambda i: (i, 0)),    # alpha*x0 stripe (bf16)
            pl.BlockSpec((hp, hp), lambda i: (0, 0)),    # beta*W1 (bf16)
        ],
        out_specs=pl.BlockSpec((tm, hp), lambda i: (i, 0)),
        compiler_params=pltpu.CompilerParams(
            dimension_semantics=("parallel",),           # megacore on v7x
            vmem_limit_bytes=vmem_limit),
    )(adj_eff, h, x0a, w1b)


def _gcn2_forward_tiled(adj_eff, h0b, x0a_b, params, betas, *, hp, tm, cap):
    np_ = adj_eff.shape[0]
    num_layers = len(betas)
    # beta folded into a bf16 W1; the (1-beta)*t identity stays exact f32
    # inside the kernel (compile-time constant) -- no bf16 diagonal absorption.
    w1b = jnp.stack([
        _pad2((betas[i] * params["w1"][i]).astype(jnp.float32), hp, hp)
        for i in range(num_layers)]).astype(jnp.bfloat16)

    budget = _fuse_budget(cap)
    if tm is None:
        tm = _derive_tm(np_, hp, budget)
    tm = int(max(16, (min(int(tm), np_) // 16) * 16))

    est = (2 * tm * np_ * 2      # adj stripes (double-buffered, bf16)
           + 2 * np_ * hp * 2    # h resident (counted 2x for safety)
           + 2 * tm * hp * 2     # alpha*x0 stripes
           + 2 * hp * hp * 2     # W1 (counted 2x)
           + 2 * tm * hp * 2)    # output stripes (bf16)
    vlim = _vmem_limit(est, cap)

    h = h0b
    for i in range(num_layers):
        h = _pallas_gcn2_layer_tiled(adj_eff, h, x0a_b, w1b[i],
                                     omb=1.0 - betas[i], tm=tm, vmem_limit=vlim)
    return h


# ---------------------------------------------------------------------------
# Full forward
# ---------------------------------------------------------------------------
def gcn2_forward(x, adj, params, *, alpha, theta, num_layers,
                 force_tiled=False, tm=None):
    """Full GCN2 forward (eval mode: dropout / BatchNorm are identity)."""
    n, _ = x.shape
    hid = params["w_lin0"].shape[1]
    np_ = _round_up(n, _LANE)        # lane-dense node dim (padded rows are 0)
    hp = _round_up(hid, _LANE)       # lane-dense hidden dim

    # Boundary projections in XLA (tiny; keeps their weights out of VMEM).
    h0 = jnp.maximum(
        jnp.dot(x.astype(jnp.float32), params["w_lin0"],
                preferred_element_type=jnp.float32) + params["b_lin0"], 0.0)
    h0p = _pad2(h0, np_, hp)                         # zero-padded rows/cols
    h0b = h0p.astype(jnp.bfloat16)
    x0a_b = (alpha * h0p).astype(jnp.bfloat16)       # alpha * x_0 (bf16 stream)

    # (1 - alpha) folded into the adjacency once; padded rows/cols are zero.
    adj_eff = _pad2(((1.0 - alpha) * adj).astype(jnp.float32), np_, np_
                    ).astype(jnp.bfloat16)

    betas = [math.log(theta / (i + 1) + 1.0) for i in range(num_layers)]

    cap = _vmem_capacity_bytes()
    # 2x-buffer-counted VMEM estimate of the fused kernel (bytes).
    est_fused = 4 * np_ * np_ + 14 * np_ * hp + 8 * hp * hp

    if force_tiled or est_fused > _fuse_budget(cap):
        h = _gcn2_forward_tiled(adj_eff, h0b, x0a_b, params, betas,
                                hp=hp, tm=tm, cap=cap)
    else:
        # W1_eff = beta*W1 + (1-beta)*I kept in f32 so the near-identity
        # diagonal survives for small beta (deep stacks).
        eye = jnp.eye(hp, dtype=jnp.float32)
        w1eff = jnp.stack([
            betas[i] * _pad2(params["w1"][i].astype(jnp.float32), hp, hp)
            + (1.0 - betas[i]) * eye
            for i in range(num_layers)])
        h = _gcn2_forward_fused(adj_eff, h0b, x0a_b, w1eff,
                                vmem_limit=_vmem_limit(est_fused, cap))

    out = jnp.dot(h[:n, :hid].astype(jnp.float32), params["w_lin1"],
                  preferred_element_type=jnp.float32) + params["b_lin1"]
    return out


# ---------------------------------------------------------------------------
# Pure-JAX reference (f32, unfolded — verifies the algebraic folding too)
# ---------------------------------------------------------------------------
def gcn2_forward_ref(x, adj, params, *, alpha, theta, num_layers):
    h = jnp.maximum(x @ params["w_lin0"] + params["b_lin0"], 0.0)
    x0 = h
    for i in range(num_layers):
        beta = math.log(theta / (i + 1) + 1.0)
        agg = adj @ h
        t = (1.0 - alpha) * agg + alpha * x0
        t = (1.0 - beta) * t + beta * (t @ params["w1"][i])
        h = jnp.maximum(t, 0.0)
    return h @ params["w_lin1"] + params["b_lin1"]


# ---------------------------------------------------------------------------
# Test harness
# ---------------------------------------------------------------------------
def _make_inputs(key, n, in_ch, hid, out_ch, num_layers):
    ks = jax.random.split(key, 4 + num_layers)
    x = jax.random.normal(ks[0], (n, in_ch), dtype=jnp.float32)

    a_raw = (jax.random.uniform(ks[1], (n, n)) < 0.1).astype(jnp.float32)
    a_sym = jnp.maximum(a_raw, a_raw.T) + jnp.eye(n, dtype=jnp.float32)
    deg = jnp.sum(a_sym, axis=1)
    dinv_sqrt = 1.0 / jnp.sqrt(deg)
    adj = a_sym * dinv_sqrt[:, None] * dinv_sqrt[None, :]

    def glorot(k, shape):
        fan_in, fan_out = shape[-2], shape[-1]
        lim = math.sqrt(6.0 / (fan_in + fan_out))
        return jax.random.uniform(k, shape, jnp.float32, -lim, lim)

    params = {
        "w_lin0": glorot(ks[2], (in_ch, hid)),
        "b_lin0": jnp.zeros((hid,), jnp.float32),
        "w_lin1": glorot(ks[3], (hid, out_ch)),
        "b_lin1": jnp.zeros((out_ch,), jnp.float32),
        "w1": [glorot(ks[4 + i], (hid, hid)) for i in range(num_layers)],
    }
    return x, adj, params


def _assert_close(out, ref, tol=5e-2):
    # bf16 matmul inputs -> compare with a relative-to-max metric.
    err = float(jnp.max(jnp.abs(out - ref))) / (float(jnp.max(jnp.abs(ref)))
                                                + 1e-6)
    assert err < tol, f"mismatch vs reference: rel_max_err={err:.4f}"


if __name__ == "__main__":
    IN_CH, HID, OUT_CH, NUM_LAYERS = 16, 32, 8, 3
    ALPHA, THETA = 0.1, 0.5
    key = jax.random.PRNGKey(0)
    k1, k2 = jax.random.split(key)

    # --- test 1: small graph (n=64 -> padded to 128 rows) -> fused path ----
    x, adj, params = _make_inputs(k1, 64, IN_CH, HID, OUT_CH, NUM_LAYERS)
    out = gcn2_forward(x, adj, params, alpha=ALPHA, theta=THETA,
                       num_layers=NUM_LAYERS)
    out = jax.block_until_ready(out)
    ref = gcn2_forward_ref(x, adj, params, alpha=ALPHA, theta=THETA,
                           num_layers=NUM_LAYERS)
    assert out.shape == (64, OUT_CH)
    _assert_close(out, ref)

    # --- test 2: bigger graph, forced row-tiled path, auto tile size -------
    x2, adj2, params2 = _make_inputs(k2, 256, IN_CH, HID, OUT_CH, NUM_LAYERS)
    out2 = gcn2_forward(x2, adj2, params2, alpha=ALPHA, theta=THETA,
                        num_layers=NUM_LAYERS, force_tiled=True)
    out2 = jax.block_until_ready(out2)
    ref2 = gcn2_forward_ref(x2, adj2, params2, alpha=ALPHA, theta=THETA,
                            num_layers=NUM_LAYERS)
    assert out2.shape == (256, OUT_CH)
    _assert_close(out2, ref2)

    # --- test 3: tiled path with several row stripes ("parallel" grid) -----
    out3 = gcn2_forward(x2, adj2, params2, alpha=ALPHA, theta=THETA,
                        num_layers=NUM_LAYERS, force_tiled=True, tm=64)
    out3 = jax.block_until_ready(out3)
    _assert_close(out3, ref2)

    print("KERNEL_OK")
</pallas_src>

<mosaic_0001>
module attributes {stable_mosaic.version = 11 : i64} {
  func.func @_gcn2_fused_kernel(%arg0: i32, %arg1: memref<128x128xbf16, #tpu.memory_space<vmem>>, %arg2: memref<128x128xbf16, #tpu.memory_space<vmem>>, %arg3: memref<128x128xbf16, #tpu.memory_space<vmem>>, %arg4: memref<1x128x128xf32, #tpu.memory_space<vmem>>, %arg5: memref<128x128xbf16, #tpu.memory_space<vmem>>, %arg6: memref<128x128xbf16, #tpu.memory_space<vmem>>) attributes {dimension_semantics = [#tpu.dimension_semantics<arbitrary>], iteration_bounds = array<i64: 3>, scalar_prefetch = 0 : i64, scratch_operands = 1 : i64, tpu.core_type = #tpu.core_type<tc>, window_params = [{pipeline_mode = #tpu.pipeline_mode<synchronous>, transform_indices = @transform_0, window_bounds = array<i64: 128, 128>}, {pipeline_mode = #tpu.pipeline_mode<synchronous>, transform_indices = @transform_1, window_bounds = array<i64: 128, 128>}, {pipeline_mode = #tpu.pipeline_mode<synchronous>, transform_indices = @transform_2, window_bounds = array<i64: 128, 128>}, {transform_indices = @transform_3, window_bounds = array<i64: 1, 128, 128>}, {pipeline_mode = #tpu.pipeline_mode<synchronous>, transform_indices = @transform_4, window_bounds = array<i64: 128, 128>}]} {
    %c0_i32 = arith.constant 0 : i32
    %0 = arith.cmpi eq, %arg0, %c0_i32 : i32
    %1 = arith.extui %0 : i1 to i32
    %c0_i32_0 = arith.constant 0 : i32
    %2 = arith.cmpi ne, %1, %c0_i32_0 : i32
    scf.if %2 {
      %c0_14 = arith.constant 0 : index
      %c0_15 = arith.constant 0 : index
      %19 = vector.load %arg1[%c0_14, %c0_15] : memref<128x128xbf16, #tpu.memory_space<vmem>>, vector<128x128xbf16>
      %c0_16 = arith.constant 0 : index
      %c0_17 = arith.constant 0 : index
      %20 = vector.load %arg6[%c0_16, %c0_17] : memref<128x128xbf16, #tpu.memory_space<vmem>>, vector<128x128xbf16>
      tpu.vector_store %arg6[%c0_16, %c0_17], %19 {strides = array<i32>} : memref<128x128xbf16, #tpu.memory_space<vmem>>, vector<128x128xbf16>,
    } else {
    }
    %c0 = arith.constant 0 : index
    %c0_1 = arith.constant 0 : index
    %3 = vector.load %arg3[%c0, %c0_1] : memref<128x128xbf16, #tpu.memory_space<vmem>>, vector<128x128xbf16>
    %c0_2 = arith.constant 0 : index
    %c0_3 = arith.constant 0 : index
    %4 = vector.load %arg6[%c0_2, %c0_3] : memref<128x128xbf16, #tpu.memory_space<vmem>>, vector<128x128xbf16>
    %cst = arith.constant dense<0.000000e+00> : vector<128x128xf32>
    %5 = tpu.matmul %3, %4, %cst {dimension_numbers = #tpu.dot_dimension_numbers<[1], [0], [0], [1], [0, 0, 1, 1], [], []>} : vector<128x128xbf16>, vector<128x128xbf16>, vector<128x128xf32> -> vector<128x128xf32>
    %c0_4 = arith.constant 0 : index
    %c0_5 = arith.constant 0 : index
    %6 = vector.load %arg2[%c0_4, %c0_5] : memref<128x128xbf16, #tpu.memory_space<vmem>>, vector<128x128xbf16>
    %7 = arith.extf %6 : vector<128x128xbf16> to vector<128x128xf32>
    %8 = arith.addf %5, %7 : vector<128x128xf32>
    %c0_6 = arith.constant 0 : index
    %c0_7 = arith.constant 0 : index
    %c0_8 = arith.constant 0 : index
    %9 = vector.load %arg4[%c0_6, %c0_7, %c0_8] : memref<1x128x128xf32, #tpu.memory_space<vmem>>, vector<1x128x128xf32>
    %10 = vector.shape_cast %9 : vector<1x128x128xf32> to vector<128x128xf32>
    %cst_9 = arith.constant dense<0.000000e+00> : vector<128x128xf32>
    %11 = tpu.matmul %8, %10, %cst_9 {dimension_numbers = #tpu.dot_dimension_numbers<[1], [0], [0], [1], [0, 0, 1, 1], [], []>} : vector<128x128xf32>, vector<128x128xf32>, vector<128x128xf32> -> vector<128x128xf32>
    %cst_10 = arith.constant 0.000000e+00 : f32
    %12 = vector.broadcast %cst_10 : f32 to vector<128x128xf32>
    %13 = arith.maximumf %11, %12 : vector<128x128xf32>
    %14 = arith.truncf %13 : vector<128x128xf32> to vector<128x128xbf16>
    %c0_11 = arith.constant 0 : index
    %c0_12 = arith.constant 0 : index
    %15 = vector.load %arg6[%c0_11, %c0_12] : memref<128x128xbf16, #tpu.memory_space<vmem>>, vector<128x128xbf16>
    tpu.vector_store %arg6[%c0_11, %c0_12], %14 {strides = array<i32>} : memref<128x128xbf16, #tpu.memory_space<vmem>>, vector<128x128xbf16>,
    %c2_i32 = arith.constant 2 : i32
    %16 = arith.cmpi eq, %arg0, %c2_i32 : i32
    %17 = arith.extui %16 : i1 to i32
    %c0_i32_13 = arith.constant 0 : i32
    %18 = arith.cmpi ne, %17, %c0_i32_13 : i32
    scf.if %18 {
      %c0_14 = arith.constant 0 : index
      %c0_15 = arith.constant 0 : index
      %19 = vector.load %arg5[%c0_14, %c0_15] : memref<128x128xbf16, #tpu.memory_space<vmem>>, vector<128x128xbf16>
      tpu.vector_store %arg5[%c0_14, %c0_15], %14 {strides = array<i32>} : memref<128x128xbf16, #tpu.memory_space<vmem>>, vector<128x128xbf16>,
    } else {
    }
    return
  }
  func.func @transform_0(%arg0: i32) -> (i32, i32) {
    %c0_i32 = arith.constant 0 : i32
    %c0_i32_0 = arith.constant 0 : i32
    %c0_i32_1 = arith.constant 0 : i32
    return %c0_i32, %c0_i32_0 : i32, i32
  }
  func.func @transform_1(%arg0: i32) -> (i32, i32) {
    %c0_i32 = arith.constant 0 : i32
    %c0_i32_0 = arith.constant 0 : i32
    %c0_i32_1 = arith.constant 0 : i32
    return %c0_i32, %c0_i32_0 : i32, i32
  }
  func.func @transform_2(%arg0: i32) -> (i32, i32) {
    %c0_i32 = arith.constant 0 : i32
    %c0_i32_0 = arith.constant 0 : i32
    %c0_i32_1 = arith.constant 0 : i32
    return %c0_i32, %c0_i32_0 : i32, i32
  }
  func.func @transform_3(%arg0: i32) -> (i32, i32, i32) {
    %c0_i32 = arith.constant 0 : i32
    %c0_i32_0 = arith.constant 0 : i32
    %c0_i32_1 = arith.constant 0 : i32
    return %arg0, %c0_i32, %c0_i32_0 : i32, i32, i32
  }
  func.func @transform_4(%arg0: i32) -> (i32, i32) {
    %c0_i32 = arith.constant 0 : i32
    %c0_i32_0 = arith.constant 0 : i32
    %c0_i32_1 = arith.constant 0 : i32
    return %c0_i32, %c0_i32_0 : i32, i32
  }
}

</mosaic_0001>

<bundles_post_ra>
// kernel: tpu_custom_call.1
= control target key start
LH: loop header
LB: loop body
LE: loop exit
PB: predicated region body
PF: predicated region fallthrough
CT: control target
= control target key end

     0   :  { %9 = vsyncpa [#allocation4], 0  ;;  %s1458_s0 = inlined_call_operand.hbm [shape: bf16[128,128], index: 0, kind: input, shape index: {}]   ;;  %s1459_s1 = inlined_call_operand.hbm [shape: bf16[128,128], index: 1, kind: input, shape index: {}]   ;;  %s1460_s2 = inlined_call_operand.hbm [shape: bf16[128,128], index: 2, kind: input, shape index: {}]   ;;  %s1461_s3 = inlined_call_operand.hbm [shape: f32[3,128,128], index: 3, kind: input, shape index: {}]   ;;  %s1462_s4 = inlined_call_operand.hbm [shape: bf16[128,128], index: 4, kind: output, shape index: {}]  }
   0x1   :  { %10 = vsyncpa [#allocation7], 0 }
   0x2   :  { %11 = vsyncpa [#allocation10], 0 }
   0x3   :  { %13 = vsyncpa [#allocation10 + $0x1], 0 }
   0x4   :  { %14 = vsyncpa [#allocation5], 0  ;;  %s1314_s15 = smov 0   ;;  %s1316_s16 = smov 0  }
   0x5   :  { %s1318_s17 = smov 0   ;;  %s1320_s18 = smov 0  }
   0x6 LB: > { %s1333_s19 = sadd.s32 4294967295, %s1277_s18   ;;  %p103_p0 = scmp.ne.s32.totalorder %s1269_s16, %s1265_s15  ;;  %s1277_s18 = sphi %s1320_s18, %s1470_s18   ;;  %s1273_s17 = sphi %s1318_s17, %s1469_s17   ;;  %s1269_s16 = sphi %s1316_s16, %s1468_s16   ;;  %s1265_s15 = sphi %s1314_s15, %s1467_s15  }
   0x7   : > { %p104_p1 = scmp.eq.s32.totalorder %s1333_s19, 0  ;;  %p743_p2 = scmp.ge.s32.totalorder %s1277_s18, 1 }
   0x8   : > { %p135_p3 = scmp.lt.s32.totalorder %s1277_s18, 4  ;;  %p744_p4 = scmp.ne.s32.totalorder %s1333_s19, 0 }
   0x9   : > { %p1342_p5 = por %p104_p1, %p103_p0  ;;  %s160_s24 = sshll.u32 %s1459_s1, 4  ;;  %s161_s24 = int_to_ptr.hbm [resolvable:$true] %s160_s24 }
   0xa   : > { %p1346_p6 = pnand %p743_p2, %p135_p3  ;;  %s1279_s25 = smov [#allocation6]  }
   0xb   : > { %s162_s26 = sshll.u32 %s1279_s25, 4  ;;  %s146_s30 = sshll.u32 %s1458_s0, 4  ;;  %s163_s26 = int_to_ptr.vmem [resolvable:$true] %s162_s26  ;;  %s147_s30 = int_to_ptr.hbm [resolvable:$true] %s146_s30 }
   0xc   : > { %p1018_p7 = pneg %p1346_p6  ;;  %s1280_s5 = smov 64  }
   0xd   : > { %s1281_s6 = smov 4   ;;  %s1282_s7 = smov [#allocation3]  }
   0xe   : > { %p1357_p8 = pnand %p1018_p7, %p104_p1  ;;  %s148_s8 = sshll.u32 %s1282_s7, 4  ;;  %s149_s8 = int_to_ptr.vmem [resolvable:$true] %s148_s8 }
   0xf   : > { %s174_s11 = sshll.u32 %s1460_s2, 4  ;;  %s1283_s12 = smov [#allocation8]   ;;  %s175_s11 = int_to_ptr.hbm [resolvable:$true] %s174_s11 }
  0x10   : > { %1024 = dma.hbm_to_vmem [thread:$0]  (!%p1357_p8), %s161_s24, 1024, %s163_s26, [#allocation7], %s1280_s5, %s1280_s5, %s1281_s6  }
  0x11   : > { %1021 = dma.hbm_to_vmem [thread:$0]  (!%p1357_p8), %s147_s30, 1024, %s149_s8, [#allocation4], %s1280_s5, %s1280_s5, %s1281_s6  }
  0x12   : > { %s176_s13 = sshll.u32 %s1283_s12, 4  ;;  %s1372_s14 = sadd.s32 1, %s1277_s18   ;;  %s177_s13 = int_to_ptr.vmem [resolvable:$true] %s176_s13 }
  0x13   : > { %1027 = dma.hbm_to_vmem [thread:$0]  (!%p1357_p8), %s175_s11, 1024, %s177_s13, [#allocation7], %s1280_s5, %s1280_s5, %s1281_s6  }
  0x14   : > { %s87_s15 = ssub.s32 %s1277_s18, %s1372_s14  ;;  %s90_s22 = sadd.s32 1, %s1273_s17 }
  0x15   : > { %p88_p9 = scmp.eq.s32.totalorder %s87_s15, 0  ;;  %p97_p10 = scmp.ne.s32.totalorder %s1273_s17, %s1269_s16 }
  0x16   : > { %p98_p11 = scmp.eq.s32.totalorder %s1277_s18, 0  ;;  %p1035_p12 = scmp.lt.s32.totalorder %s1277_s18, 3 }
  0x17   : > { %s1384_s23 = scalar_select %p88_p9, %s1273_s17, %s90_s22  }
  0x18   : > { %p99_p13 = por %p98_p11, %p97_p10  ;;  %s190_s24 = sand.u32 1, %s1273_s17  }
  0x19   : > { %s748_s25 = sshll.u32 %s190_s24, 7  ;;  %s826_s26 = sshll.u32 %s1277_s18, 7 }
  0x1a   : > { %s199_s30 = scalar_lea.hbm %s1461_s3, %s826_s26  ;;  %s194_s7 = scalar_lea.vmem [#allocation9], %s748_s25 }
  0x1b   : > { %s202_s27 = sshll.u32 %s194_s7, 4  ;;  %s200_s8 = sshll.u32 %s199_s30, 4  ;;  %s203_s27 = int_to_ptr.vmem [resolvable:$true] %s202_s27  ;;  %s201_s8 = int_to_ptr.hbm [resolvable:$true] %s200_s8 }
  0x1c   : > { %p1391_p0 = pnand %p1035_p12, %p99_p13  ;;  %s191_s6 = scalar_lea.sflag [#allocation10], %s190_s24 }
  0x1d   : > { %s1173_s9 = sshra.s32 %s201_s8, 4  ;;  %s1180_s12 = scalar_lea.hbm %s1461_s3, 384  ;;  %s1174_s9 = int_to_ptr.hbm [resolvable:$true] %s1173_s9 }
  0x1e   : > { %s1175_s10 = scalar_lea.hbm %s1174_s9, 128  ;;  %p1177_p3 = pneg %p1391_p0 }
  0x1f   : > { %p1176_p2 = scmp.ne.s32.totalorder %s1174_s9, %s1175_s10  ;;  %p1181_p9 = scmp.lt.s32.totalorder %s1174_s9, %s1461_s3 }
  0x20   : > { %p1182_p10 = scmp.lt.s32.totalorder %s1180_s12, %s1175_s10 }
  0x21   : > { %p1178_p7 = pnand %p1177_p3, %p1176_p2 }
  0x22   : > { %p1183_p11 = por %p1182_p10, %p1181_p9 }
  0x23   : > { %p1179_p8 = pneg %p1178_p7 }
  0x25   : > { %p1184_p12 = pnand %p1183_p11, %p1179_p8 }
  0x27   : > { %1187 = shalt.err (!%p1184_p12)
}
  0x28   : > { %s1284_s22 = smov 128   ;;  %s1285_s24 = smov 8  }
  0x29   : > { %1031 = dma.hbm_to_vmem [thread:$0]  (!%p1391_p0), %s201_s8, 2048, %s203_s27, %s191_s6, %s1284_s22, %s1284_s22, %s1285_s24  }
  0x2a   : > { %214 = sbr.rel (%p1346_p6) target bundleno = 447 (0x1bf), region = 36 }
  0x2f   : > { %1248 = dma.done.wait (%p104_p1), [#allocation4], 1024  }
  0x30   : > { %1250 = vsyncadd (%p104_p1), [#allocation4], 4294966272 }
  0x31   : > { %1252 = dma.done.wait (%p104_p1), [#allocation7], 2048  }
  0x32   : > { %1254 = vsyncadd (%p104_p1), [#allocation7], 4294965248  ;;  %s231_s25 = sand.u32 1, %s1269_s16  }
  0x33   : > { %s755_s26 = sshll.u32 %s231_s25, 7  ;;  %s232_s28 = scalar_lea.sflag [#allocation10], %s231_s25 }
  0x34   : > { %s1416_s29 = scalar_lea.vmem [#allocation9], %s755_s26 }
  0x35   : > { %1256 = dma.done.wait (%p1342_p5), %s232_s28, 2048  }
  0x36   : > { %1258 = vsyncadd (%p1342_p5), %s232_s28, 4294965248  ;;  %259 = sbr.rel (%p744_p4) target bundleno = 68 (0x44), region = 56 }
  0x3b   : > { %v260_v0 = vld [vmem:[#allocation3] sm:$0xff]   ;;  %v262_v1 = vld [vmem:[#allocation3 + $0x8] sm:$0xff]   ;;  %v264_v2 = vld [vmem:[#allocation3 + $0x10] sm:$0xff]  }
  0x3c   : > { %276 = vst [vmem:[#allocation2] sm:$0xff] %v260_v0   ;;  %v266_v3 = vld [vmem:[#allocation3 + $0x18] sm:$0xff]   ;;  %v268_v4 = vld [vmem:[#allocation3 + $0x20] sm:$0xff]   ;;  %v270_v5 = vld [vmem:[#allocation3 + $0x28] sm:$0xff]  }
  0x3d   : > { %278 = vst [vmem:[#allocation2 + $0x8] sm:$0xff] %v262_v1   ;;  %v272_v6 = vld [vmem:[#allocation3 + $0x30] sm:$0xff]   ;;  %v274_v7 = vld [vmem:[#allocation3 + $0x38] sm:$0xff]  }
  0x3e   : > { %280 = vst [vmem:[#allocation2 + $0x10] sm:$0xff] %v264_v2  }
  0x3f   : > { %282 = vst [vmem:[#allocation2 + $0x18] sm:$0xff] %v266_v3  }
  0x40   : > { %284 = vst [vmem:[#allocation2 + $0x20] sm:$0xff] %v268_v4  }
  0x41   : > { %286 = vst [vmem:[#allocation2 + $0x28] sm:$0xff] %v270_v5  }
  0x42   : > { %288 = vst [vmem:[#allocation2 + $0x30] sm:$0xff] %v272_v6  }
  0x43   : > { %290 = vst [vmem:[#allocation2 + $0x38] sm:$0xff] %v274_v7  }
  0x44 PF: > { %v836_v14 = vld [vmem:[#allocation2 + $0x8] sm:$0xff]  ;;  %v835_v15 = vld [vmem:[#allocation2] sm:$0xff]  ;;  %v516_v20 = vld [vmem:[%s1416_s29 + $0x78] sm:$0xff]  ;;  %p821_p1 = scmp.ne.s32.totalorder %s1333_s19, 2 }
  0x45   : > { %v837_v13 = vld [vmem:[#allocation2 + $0x10] sm:$0xff]  ;;  %v831_v16 = vld [vmem:[#allocation8 + $0x20] sm:$0xff]  ;;  %v832_v18 = vld [vmem:[#allocation8 + $0x28] sm:$0xff]  ;;  %517 = vmatpush.msra.mxu1 %v516_v20  ;;  %984 = vmatpush.msra.mxu3 %v516_v20 }
  0x46   : > { %v838_v12 = vld [vmem:[#allocation2 + $0x18] sm:$0xff]  ;;  %v827_v17 = vld [vmem:[#allocation8] sm:$0xff]  ;;  %v828_v19 = vld [vmem:[#allocation8 + $0x8] sm:$0xff] }
  0x47   : > { %v839_v11 = vld [vmem:[#allocation2 + $0x20] sm:$0xff]  ;;  %v515_v21 = vld [vmem:[%s1416_s29 + $0x70] sm:$0xff]  ;;  %v514_v22 = vld [vmem:[%s1416_s29 + $0x68] sm:$0xff] }
  0x48   : > { %v840_v10 = vld [vmem:[#allocation2 + $0x28] sm:$0xff]  ;;  %518 = vmatpush.msra.mxu1 %v515_v21  ;;  %985 = vmatpush.msra.mxu3 %v515_v21  ;;  %v513_v23 = vld [vmem:[%s1416_s29 + $0x60] sm:$0xff]  ;;  %v512_v24 = vld [vmem:[%s1416_s29 + $0x58] sm:$0xff] }
  0x49   : > { %v841_v9 = vld [vmem:[#allocation2 + $0x30] sm:$0xff]  ;;  %v510_v26 = vld [vmem:[%s1416_s29 + $0x48] sm:$0xff]  ;;  %v509_v29 = vld [vmem:[%s1416_s29 + $0x40] sm:$0xff] }
  0x4a   : > { %v842_v8 = vld [vmem:[#allocation2 + $0x38] sm:$0xff]  ;;  %519 = vmatpush.msra.mxu1 %v514_v22  ;;  %986 = vmatpush.msra.mxu3 %v514_v22  ;;  %v511_v25 = vld [vmem:[%s1416_s29 + $0x50] sm:$0xff]  ;;  %v506_v32 = vld [vmem:[%s1416_s29 + $0x28] sm:$0xff] }
  0x4b   : > { %976 = vmatpush.bf16.msra.mxu2 %v842_v8  ;;  %452 = vmatpush.bf16.msra.mxu0 %v842_v8  ;;  %v833_v27 = vld [vmem:[#allocation8 + $0x30] sm:$0xff]  ;;  %v508_v30 = vld [vmem:[%s1416_s29 + $0x38] sm:$0xff]  ;;  %v505_v33 = vld [vmem:[%s1416_s29 + $0x20] sm:$0xff] }
  0x4c   : > { %520 = vmatpush.msra.mxu1 %v513_v23  ;;  %987 = vmatpush.msra.mxu3 %v513_v23  ;;  %v829_v28 = vld [vmem:[#allocation8 + $0x10] sm:$0xff]  ;;  %v504_v34 = vld [vmem:[%s1416_s29 + $0x18] sm:$0xff]  ;;  %v502_v38 = vld [vmem:[%s1416_s29 + $0x8] sm:$0xff] }
  0x4d   : > { %v507_v31 = vld [vmem:[%s1416_s29 + $0x30] sm:$0xff]  ;;  %v834_v36 = vld [vmem:[#allocation8 + $0x38] sm:$0xff]  ;;  %v501_v39 = vld [vmem:[%s1416_s29] sm:$0xff] }
  0x4e   : > { %521 = vmatpush.msra.mxu1 %v512_v24  ;;  %988 = vmatpush.msra.mxu3 %v512_v24  ;;  %v503_v35 = vld [vmem:[%s1416_s29 + $0x10] sm:$0xff]  ;;  %v830_v37 = vld [vmem:[#allocation8 + $0x18] sm:$0xff]  ;;  %v844_v40 = vld [vmem:[#allocation6] sm:$0xff]  }
  0x4f   : > { %977 = vmatpush.bf16.msra.mxu2 %v841_v9  ;;  %453 = vmatpush.bf16.msra.mxu0 %v841_v9  ;;  %v845_v41 = vunpack.c.l.bf16 %v844_v40  ;;  %v958_v43 = vld [vmem:[#allocation6 + $0x20] sm:$0xff]   ;;  %v846_v46 = vunpack.c.h.bf16 %v844_v40  ;;  %v955_v51 = vld [vmem:[#allocation6 + $0x8] sm:$0xff]   ;;  %v956_v1 = vld [vmem:[#allocation6 + $0x10] sm:$0xff]  }
  0x50   : > { %522 = vmatpush.msra.mxu1 %v511_v25  ;;  %989 = vmatpush.msra.mxu3 %v511_v25  ;;  %v861_v45 = vunpack.c.l.bf16 %v958_v43  ;;  %v862_v52 = vunpack.c.h.bf16 %v958_v43  ;;  %v849_v53 = vunpack.c.l.bf16 %v955_v51  ;;  %v959_v57 = vld [vmem:[#allocation6 + $0x28] sm:$0xff]   ;;  %v850_v60 = vunpack.c.h.bf16 %v955_v51  ;;  %v960_v7 = vld [vmem:[#allocation6 + $0x30] sm:$0xff]   ;;  %v961_v21 = vld [vmem:[#allocation6 + $0x38] sm:$0xff]  }
  0x51   : > { %v865_v59 = vunpack.c.l.bf16 %v959_v57  ;;  %v866_v2 = vunpack.c.h.bf16 %v959_v57  ;;  %v853_v3 = vunpack.c.l.bf16 %v956_v1  ;;  %v869_v9 = vunpack.c.l.bf16 %v960_v7 }
  0x52   : > { %523 = vmatpush.msra.mxu1 %v510_v26  ;;  %990 = vmatpush.msra.mxu3 %v510_v26  ;;  %v873_v23 = vunpack.c.l.bf16 %v961_v21 }
  0x53   : > { %978 = vmatpush.bf16.msra.mxu2 %v840_v10  ;;  %454 = vmatpush.bf16.msra.mxu0 %v840_v10  ;;  %v854_v10 = vunpack.c.h.bf16 %v956_v1 }
  0x54   : > { %524 = vmatpush.msra.mxu1 %v509_v29  ;;  %991 = vmatpush.msra.mxu3 %v509_v29  ;;  %v874_v29 = vunpack.c.h.bf16 %v961_v21 }
  0x56   : > { %525 = vmatpush.msra.mxu1 %v508_v30  ;;  %992 = vmatpush.msra.mxu3 %v508_v30 }
  0x57   : > { %979 = vmatpush.bf16.msra.mxu2 %v839_v11  ;;  %455 = vmatpush.bf16.msra.mxu0 %v839_v11 }
  0x58   : > { %526 = vmatpush.msra.mxu1 %v507_v31  ;;  %993 = vmatpush.msra.mxu3 %v507_v31 }
  0x5a   : > { %527 = vmatpush.msra.mxu1 %v506_v32  ;;  %994 = vmatpush.msra.mxu3 %v506_v32 }
  0x5b   : > { %980 = vmatpush.bf16.msra.mxu2 %v838_v12  ;;  %456 = vmatpush.bf16.msra.mxu0 %v838_v12 }
  0x5c   : > { %528 = vmatpush.msra.mxu1 %v505_v33  ;;  %995 = vmatpush.msra.mxu3 %v505_v33 }
  0x5e   : > { %529 = vmatpush.msra.mxu1 %v504_v34  ;;  %996 = vmatpush.msra.mxu3 %v504_v34 }
  0x5f   : > { %981 = vmatpush.bf16.msra.mxu2 %v837_v13  ;;  %457 = vmatpush.bf16.msra.mxu0 %v837_v13 }
  0x60   : > { %530 = vmatpush.msra.mxu1 %v503_v35  ;;  %997 = vmatpush.msra.mxu3 %v503_v35 }
  0x62   : > { %531 = vmatpush.msra.mxu1 %v502_v38  ;;  %998 = vmatpush.msra.mxu3 %v502_v38 }
  0x63   : > { %982 = vmatpush.bf16.msra.mxu2 %v836_v14  ;;  %458 = vmatpush.bf16.msra.mxu0 %v836_v14 }
  0x64   : > { %532 = vmatpush.msra.mxu1 %v501_v39  ;;  %999 = vmatpush.msra.mxu3 %v501_v39 }
  0x67   : > { %983 = vmatpush.bf16.msra.mxu2 %v835_v15  ;;  %459 = vmatpush.bf16.msra.mxu0 %v835_v15  ;;  %v957_v15 = vld [vmem:[#allocation6 + $0x18] sm:$0xff]  }
  0x68   : > { %v858_v24 = vunpack.c.h.bf16 %v957_v15 }
  0x6a   : > { %480 = vmatmul.bf16.vlgmr.msra.gmra.mxu2 %v831_v16  ;;  %460 = vmatmul.bf16.vlgmr.msra.gmra.mxu0 %v827_v17  ;;  %v870_v16 = vunpack.c.h.bf16 %v960_v7  ;;  %v857_v17 = vunpack.c.l.bf16 %v957_v15 }
  0x7a   : > { %485 = vmatmul.bf16.gmra.mxu2 %v832_v18  ;;  %465 = vmatmul.bf16.gmra.mxu0 %v828_v19 }
  0x8a   : > { %490 = vmatmul.bf16.gmra.mxu2 %v833_v27  ;;  %470 = vmatmul.bf16.gmra.mxu0 %v829_v28 }
  0x9a   : > { %495 = vmatmul.bf16.gmra.mxu2 %v834_v36  ;;  %475 = vmatmul.bf16.gmra.mxu0 %v830_v37 }
  0xe7   : > { %v461_v42 = vpop.f32.mrf.mxu0 }
  0xe8   : > { %v462_v44 = vadd.f32 %v845_v41, %v461_v42 }
  0xea   : > { %533 = vmatmul.f32.vlgmr.msra.gmra.mxu1 %v462_v44 }
  0xed   : > { %v481_v47 = vpop.f32.mrf.mxu2 }
  0xee   : > { %v482_v48 = vadd.f32 %v861_v45, %v481_v47 }
  0xef   : > { %v463_v49 = vpop.f32.mrf.mxu0 }
  0xf0   : > { %557 = vmatmul.f32.vlgmr.msra.gmra.mxu3 %v482_v48  ;;  %v464_v50 = vadd.f32 %v846_v46, %v463_v49 }
  0xf2   : > { %536 = vmatmul.f32.gmra.mxu1 %v464_v50 }
  0xf5   : > { %v483_v54 = vpop.f32.mrf.mxu2 }
  0xf6   : > { %v484_v55 = vadd.f32 %v862_v52, %v483_v54 }
  0xf7   : > { %v466_v56 = vpop.f32.mrf.mxu0 }
  0xf8   : > { %560 = vmatmul.f32.gmra.mxu3 %v484_v55  ;;  %v467_v58 = vadd.f32 %v849_v53, %v466_v56 }
  0xfa   : > { %539 = vmatmul.f32.gmra.mxu1 %v467_v58 }
  0xfd   : > { %v486_v61 = vpop.f32.mrf.mxu2 }
  0xfe   : > { %v487_v62 = vadd.f32 %v865_v59, %v486_v61 }
  0xff   : > { %v468_v63 = vpop.f32.mrf.mxu0 }
 0x100   : > { %563 = vmatmul.f32.gmra.mxu3 %v487_v62  ;;  %v469_v0 = vadd.f32 %v850_v60, %v468_v63 }
 0x102   : > { %542 = vmatmul.f32.gmra.mxu1 %v469_v0 }
 0x105   : > { %v488_v4 = vpop.f32.mrf.mxu2 }
 0x106   : > { %v489_v5 = vadd.f32 %v866_v2, %v488_v4 }
 0x107   : > { %v471_v6 = vpop.f32.mrf.mxu0 }
 0x108   : > { %566 = vmatmul.f32.gmra.mxu3 %v489_v5  ;;  %v472_v8 = vadd.f32 %v853_v3, %v471_v6 }
 0x10a   : > { %545 = vmatmul.f32.gmra.mxu1 %v472_v8 }
 0x10d   : > { %v491_v11 = vpop.f32.mrf.mxu2 }
 0x10e   : > { %v492_v12 = vadd.f32 %v869_v9, %v491_v11 }
 0x10f   : > { %v473_v13 = vpop.f32.mrf.mxu0 }
 0x110   : > { %569 = vmatmul.f32.gmra.mxu3 %v492_v12  ;;  %v474_v14 = vadd.f32 %v854_v10, %v473_v13 }
 0x112   : > { %548 = vmatmul.f32.gmra.mxu1 %v474_v14 }
 0x115   : > { %v493_v18 = vpop.f32.mrf.mxu2 }
 0x116   : > { %v494_v19 = vadd.f32 %v870_v16, %v493_v18 }
 0x117   : > { %v476_v20 = vpop.f32.mrf.mxu0 }
 0x118   : > { %572 = vmatmul.f32.gmra.mxu3 %v494_v19  ;;  %v477_v22 = vadd.f32 %v857_v17, %v476_v20 }
 0x11a   : > { %551 = vmatmul.f32.gmra.mxu1 %v477_v22 }
 0x11d   : > { %v496_v25 = vpop.f32.mrf.mxu2 }
 0x11e   : > { %v497_v26 = vadd.f32 %v873_v23, %v496_v25 }
 0x11f   : > { %v478_v27 = vpop.f32.mrf.mxu0 }
 0x120   : > { %575 = vmatmul.f32.gmra.mxu3 %v497_v26  ;;  %v479_v28 = vadd.f32 %v858_v24, %v478_v27 }
 0x122   : > { %554 = vmatmul.f32.gmra.mxu1 %v479_v28 }
 0x125   : > { %v498_v30 = vpop.f32.mrf.mxu2 }
 0x126   : > { %v499_v31 = vadd.f32 %v874_v29, %v498_v30 }
 0x128   : > { %578 = vmatmul.f32.gmra.mxu3 %v499_v31 }
 0x167   : > { %v534_v32 = vpop.f32.mrf.mxu1 }
 0x168   : > { %v582_v33 = vmax.f32 %v534_v32, 0.0 }
 0x16f   : > { %v537_v34 = vpop.f32.mrf.mxu1 }
 0x170   : > { %v583_v35 = vmax.f32 %v537_v34, 0.0 }
 0x172   : > { %v878_v36 = vpack.c.bf16 %v583_v35, %v582_v33 }
 0x173   : > { %v558_v37 = vpop.f32.mrf.mxu3 }
 0x174   : > { %879 = vst [vmem:[#allocation2] sm:$0xff] %v878_v36   ;;  %v590_v40 = vmax.f32 %v558_v37, 0.0 }
 0x177   : > { %v540_v38 = vpop.f32.mrf.mxu1 }
 0x178   : > { %v584_v42 = vmax.f32 %v540_v38, 0.0 }
 0x17b   : > { %v561_v39 = vpop.f32.mrf.mxu3 }
 0x17c   : > { %v591_v41 = vmax.f32 %v561_v39, 0.0 }
 0x17e   : > { %v898_v43 = vpack.c.bf16 %v591_v41, %v590_v40 }
 0x17f   : > { %v543_v44 = vpop.f32.mrf.mxu1 }
 0x180   : > { %965 = vst [vmem:[#allocation2 + $0x20] sm:$0xff] %v898_v43   ;;  %v585_v45 = vmax.f32 %v543_v44, 0.0 }
 0x182   : > { %v883_v46 = vpack.c.bf16 %v585_v45, %v584_v42 }
 0x183   : > { %v564_v47 = vpop.f32.mrf.mxu3 }
 0x184   : > { %962 = vst [vmem:[#allocation2 + $0x8] sm:$0xff] %v883_v46   ;;  %v592_v50 = vmax.f32 %v564_v47, 0.0 }
 0x187   : > { %v546_v48 = vpop.f32.mrf.mxu1 }
 0x188   : > { %v586_v52 = vmax.f32 %v546_v48, 0.0 }
 0x18b   : > { %v567_v49 = vpop.f32.mrf.mxu3 }
 0x18c   : > { %v593_v51 = vmax.f32 %v567_v49, 0.0 }
 0x18e   : > { %v903_v53 = vpack.c.bf16 %v593_v51, %v592_v50 }
 0x18f   : > { %v549_v54 = vpop.f32.mrf.mxu1 }
 0x190   : > { %966 = vst [vmem:[#allocation2 + $0x28] sm:$0xff] %v903_v53   ;;  %v587_v55 = vmax.f32 %v549_v54, 0.0 }
 0x192   : > { %v888_v56 = vpack.c.bf16 %v587_v55, %v586_v52 }
 0x193   : > { %v570_v57 = vpop.f32.mrf.mxu3 }
 0x194   : > { %963 = vst [vmem:[#allocation2 + $0x10] sm:$0xff] %v888_v56   ;;  %v594_v60 = vmax.f32 %v570_v57, 0.0 }
 0x197   : > { %v552_v58 = vpop.f32.mrf.mxu1 }
 0x198   : > { %v588_v62 = vmax.f32 %v552_v58, 0.0 }
 0x19b   : > { %v573_v59 = vpop.f32.mrf.mxu3 }
 0x19c   : > { %v595_v61 = vmax.f32 %v573_v59, 0.0 }
 0x19e   : > { %v908_v63 = vpack.c.bf16 %v595_v61, %v594_v60 }
 0x19f   : > { %v555_v0 = vpop.f32.mrf.mxu1 }
 0x1a0   : > { %967 = vst [vmem:[#allocation2 + $0x30] sm:$0xff] %v908_v63   ;;  %v589_v1 = vmax.f32 %v555_v0, 0.0 }
 0x1a2   : > { %v893_v2 = vpack.c.bf16 %v589_v1, %v588_v62 }
 0x1a3   : > { %v576_v3 = vpop.f32.mrf.mxu3 }
 0x1a4   : > { %964 = vst [vmem:[#allocation2 + $0x18] sm:$0xff] %v893_v2   ;;  %v596_v5 = vmax.f32 %v576_v3, 0.0 }
 0x1ab   : > { %v579_v4 = vpop.f32.mrf.mxu3 }
 0x1ac   : > { %v597_v6 = vmax.f32 %v579_v4, 0.0  ;;  %633 = sbr.rel (%p821_p1) target bundleno = 441 (0x1b9), region = 60 }
 0x1ae   : > { %v913_v7 = vpack.c.bf16 %v597_v6, %v596_v5 }
 0x1b0   : > { %968 = vst [vmem:[#allocation2 + $0x38] sm:$0xff] %v913_v7  }
 0x1b1   : > { %919 = vst [vmem:[#allocation11] sm:$0xff] %v878_v36  }
 0x1b2   : > { %969 = vst [vmem:[#allocation11 + $0x8] sm:$0xff] %v883_v46  }
 0x1b3   : > { %970 = vst [vmem:[#allocation11 + $0x10] sm:$0xff] %v888_v56  }
 0x1b4   : > { %971 = vst [vmem:[#allocation11 + $0x18] sm:$0xff] %v893_v2  }
 0x1b5   : > { %972 = vst [vmem:[#allocation11 + $0x20] sm:$0xff] %v898_v43  }
 0x1b6   : > { %973 = vst [vmem:[#allocation11 + $0x28] sm:$0xff] %v903_v53  }
 0x1b7   : > { %974 = vst [vmem:[#allocation11 + $0x30] sm:$0xff] %v908_v63  }
 0x1b8   : > { %975 = vst [vmem:[#allocation11 + $0x38] sm:$0xff] %v913_v7  }
 0x1b9 PF: > { %p1039_p4 = scmp.eq.s32.totalorder %s1333_s19, 2  ;;  %s1286_s20 = smov [#allocation11]  }
 0x1ba   : > { %s655_s21 = sshll.u32 %s1286_s20, 4  ;;  %s657_s27 = sshll.u32 %s1462_s4, 4  ;;  %s656_s21 = int_to_ptr.vmem [resolvable:$true] %s655_s21  ;;  %s658_s27 = int_to_ptr.hbm [resolvable:$true] %s657_s27 }
 0x1bb   : > { %s1287_s8 = smov 64   ;;  %s1288_s5 = smov 4  }
 0x1bc   : > { %1015 = dma.vmem_to_hbm [thread:$0]  (%p1039_p4), %s656_s21, 1024, %s658_s27, [#allocation5], %s1287_s8, %s1287_s8, %s1288_s5  }
 0x1bd   : > { %1260 = dma.done.wait (%p1039_p4), [#allocation5], 1024  }
 0x1be   : > { %1262 = vsyncadd (%p1039_p4), [#allocation5], 4294966272 }
 0x1bf PF: > { %p17_p5 = scmp.ge.s32.totalorder %s1372_s14, 5   ;;  %s1467_s15 = smov %s1269_s16 }
 0x1c0   : > { %s1468_s16 = smov %s1273_s17  ;;  %s1469_s17 = smov %s1384_s23 }
 0x1c1   : > { %s1470_s18 = smov %s1372_s14  ;;  %19 = sbr.rel (!%p17_p5) target bundleno = 6 (0x6), region = 94 }
 0x1c6   :  { %674 = vsyncpa [#allocation4], 1 }
 0x1c7   :  { %676 = vsyncpa [#allocation4 + $0x1], 1 }
 0x1c8   :  { %677 = vsyncpa [#allocation7], 1 }
 0x1c9   :  { %678 = vsyncpa [#allocation10], 1 }
 0x1ca   :  { %680 = vsyncpa [#allocation10 + $0x1], 1 }
 0x1cb   :  { %681 = vsyncpa [#allocation5], 1 }
 0x1cc   :  { %683 = vsyncpa [#allocation5 + $0x1], 1 }

</bundles_post_ra>
